<compile_context>
chip_gen: v7x
topology: tpu7x:2x2x1
jax: 0.10.0
libtpu: 0.0.40
codegen_flags: <defaults>
</compile_context>

<pallas_src>
import math

import jax
import jax.numpy as jnp
from jax import lax
from jax.experimental import pallas as pl
from jax.experimental.pallas import tpu as pltpu


def _make_deep_rnn_kernel(T, B, feat_sizes, hidden_sizes):
    """Build a fused kernel for an L-layer masked vanilla RNN (tanh).

    Kernel ref order: x_flat, (w_ih_T, w_hh_T, bias) * L, out, act_scratch * (L-1).
    All sequence slabs are flattened to (T*B, feature); row block t*B:(t+1)*B is
    time step t.
    """
    L = len(hidden_sizes)

    def kernel(*refs):
        x_ref = refs[0]                       # (T*B, F0)
        param_refs = refs[1:1 + 3 * L]
        out_ref = refs[1 + 3 * L]             # (B, H_last)
        act_refs = refs[2 + 3 * L:]           # (L-1) VMEM scratch: (T*B, H_i)

        for i in range(L):
            F, H = feat_sizes[i], hidden_sizes[i]
            w_ih_t = param_refs[3 * i][...]       # (F, H)  pre-masked, pre-transposed
            w_hh_t = param_refs[3 * i + 1][...]   # (H, H)  pre-masked, pre-transposed
            bias = param_refs[3 * i + 2][...]     # (1, H)  b_ih + b_hh

            in_seq = x_ref[...] if i == 0 else act_refs[i - 1][...]   # (T*B, F)

            # Hoisted, non-recurrent input-to-hidden projection for ALL timesteps:
            # one (T*B, F) @ (F, H) matmul instead of T tiny per-step matmuls.
            ig = jnp.dot(in_seq, w_ih_t,
                         preferred_element_type=jnp.float32) + bias   # (T*B, H)

            # Irreducible recurrence.  h0 = 0, so step 0 is just tanh(igate + b).
            h = jnp.tanh(ig[0:B])
            if i < L - 1:
                act_refs[i][0:B, :] = h
            for t in range(1, T):             # short static trip count -> fully unrolled
                h = jnp.tanh(ig[t * B:(t + 1) * B]
                             + jnp.dot(h, w_hh_t, preferred_element_type=jnp.float32))
                if i < L - 1:
                    act_refs[i][t * B:(t + 1) * B, :] = h

            if i == L - 1:
                # Only the final hidden state of the last layer leaves VMEM.
                out_ref[...] = h.astype(out_ref.dtype)

    return kernel


def masked_deep_rnn_forward(x, params):
    """MaskedDeepRNN.forward (batch_first=False).

    x: (T, B, input_size); params: list of per-layer dicts with keys
    weight_ih (H,F), weight_hh (H,H), bias_ih (H,), bias_hh (H,),
    mask_i2h (H,F) bool, mask_h2h (H,H) bool.
    Returns (B, H_last): the last layer's hidden state at the final time step.
    """
    T, B, F0 = x.shape
    dtype = x.dtype
    L = len(params)

    feat_sizes, hidden_sizes = [], []
    kernel_args = [x.reshape(T * B, F0)]          # flatten time into sublanes once
    f = F0
    for p in params:
        H = p["weight_ih"].shape[0]
        feat_sizes.append(f)
        hidden_sizes.append(H)
        # Fuse mask into weight, pre-transpose to contraction-friendly layout and
        # pre-sum the two biases -- all ONCE, outside the kernel / time loop.
        w_ih_t = (p["weight_ih"] * p["mask_i2h"].astype(dtype)).T     # (F, H)
        w_hh_t = (p["weight_hh"] * p["mask_h2h"].astype(dtype)).T     # (H, H)
        bias = (p["bias_ih"] + p["bias_hh"]).reshape(1, H)
        kernel_args += [w_ih_t, w_hh_t, bias]
        f = H
    H_last = hidden_sizes[-1]

    # Inter-layer activation sequences live in VMEM scratch (never touch HBM).
    scratch_shapes = [pltpu.VMEM((T * B, hidden_sizes[i]), jnp.float32)
                      for i in range(L - 1)]

    # VMEM budget guard (matters for scaled-up configs on v7x's 64 MiB per core):
    # inputs + scratch, with 2x headroom, clamped to [32 MiB, 64 MiB].
    arg_bytes = sum(int(a.size) * a.dtype.itemsize for a in kernel_args)
    scr_bytes = sum(T * B * h * 4 for h in hidden_sizes[:-1])
    vmem_limit = min(64 * 1024 * 1024,
                     max(32 * 1024 * 1024, 2 * (arg_bytes + scr_bytes)))

    vmem_spec = pl.BlockSpec(memory_space=pltpu.MemorySpace.VMEM)
    return pl.pallas_call(
        _make_deep_rnn_kernel(T, B, tuple(feat_sizes), tuple(hidden_sizes)),
        out_shape=jax.ShapeDtypeStruct((B, H_last), dtype),
        in_specs=[vmem_spec] * len(kernel_args),
        out_specs=vmem_spec,
        scratch_shapes=scratch_shapes,
        compiler_params=pltpu.CompilerParams(vmem_limit_bytes=vmem_limit),
    )(*kernel_args)


def init_masked_deep_rnn_params(key, input_size, hidden_layers, dtype=jnp.float32,
                                prune_threshold=0.0):
    """Matches BaseRecurrentLayer.reset_parameters (uniform ±1/sqrt(H)).  Masks
    default to all-ones; prune_threshold > 0 mimics BaseMaskModule.apply_mask
    (mask = |w| >= threshold) so the mask path is exercised."""
    params = []
    in_size = input_size
    for hidden_size in hidden_layers:
        stdv = 1.0 / math.sqrt(hidden_size)
        key, k1, k2, k3, k4 = jax.random.split(key, 5)
        weight_ih = jax.random.uniform(k1, (hidden_size, in_size), dtype, -stdv, stdv)
        weight_hh = jax.random.uniform(k2, (hidden_size, hidden_size), dtype, -stdv, stdv)
        params.append(dict(
            weight_ih=weight_ih,
            weight_hh=weight_hh,
            bias_ih=jax.random.uniform(k3, (hidden_size,), dtype, -stdv, stdv),
            bias_hh=jax.random.uniform(k4, (hidden_size,), dtype, -stdv, stdv),
            mask_i2h=(jnp.abs(weight_ih) >= prune_threshold),
            mask_h2h=(jnp.abs(weight_hh) >= prune_threshold),
        ))
        in_size = hidden_size
    return params


def _reference_forward(x, params):
    """Pure-JAX reference (lax.scan) for correctness checking."""
    out = x
    for p in params:
        H = p["weight_ih"].shape[0]
        B = x.shape[1]
        w_ih = p["weight_ih"] * p["mask_i2h"].astype(x.dtype)
        w_hh = p["weight_hh"] * p["mask_h2h"].astype(x.dtype)

        def step(h, x_t, w_ih=w_ih, w_hh=w_hh, b_ih=p["bias_ih"], b_hh=p["bias_hh"]):
            igate = x_t @ w_ih.T + b_ih
            hgate = h @ w_hh.T + b_hh
            h_new = jnp.tanh(igate + hgate)
            return h_new, h_new

        h0 = jnp.zeros((B, H), x.dtype)
        _, out = lax.scan(step, h0, out)
    return out[-1]


if __name__ == "__main__":
    # Small shapes consistent with the module: seq=8, batch=8, input=16, hidden=[32, 32]
    SEQ, BATCH, INPUT = 8, 8, 16
    HIDDEN_LAYERS = [32, 32]

    key = jax.random.PRNGKey(0)
    key, kx = jax.random.split(key)
    x = jax.random.normal(kx, (SEQ, BATCH, INPUT), jnp.float32)  # (seq, batch, feature)

    # Prune ~30% of the weights so the masking path is genuinely exercised.
    params = init_masked_deep_rnn_params(key, INPUT, HIDDEN_LAYERS,
                                         prune_threshold=0.05)

    fwd = jax.jit(masked_deep_rnn_forward)
    out = jax.block_until_ready(fwd(x, params))

    ref = _reference_forward(x, params)
    assert out.shape == (BATCH, HIDDEN_LAYERS[-1]), out.shape
    assert jnp.allclose(out, ref, atol=1e-5, rtol=1e-5), "mismatch vs reference"

    print("KERNEL_OK")
</pallas_src>

<mosaic_0001>
module attributes {stable_mosaic.version = 11 : i64} {
  func.func @kernel(%arg0: memref<64x16xf32, #tpu.memory_space<vmem>>, %arg1: memref<16x32xf32, #tpu.memory_space<vmem>>, %arg2: memref<32x32xf32, #tpu.memory_space<vmem>>, %arg3: memref<1x32xf32, #tpu.memory_space<vmem>>, %arg4: memref<32x32xf32, #tpu.memory_space<vmem>>, %arg5: memref<32x32xf32, #tpu.memory_space<vmem>>, %arg6: memref<1x32xf32, #tpu.memory_space<vmem>>, %arg7: memref<8x32xf32, #tpu.memory_space<vmem>>, %arg8: memref<64x32xf32, #tpu.memory_space<vmem>>) attributes {dimension_semantics = [], scalar_prefetch = 0 : i64, scratch_operands = 1 : i64, tpu.core_type = #tpu.core_type<tc>} {
    %c0 = arith.constant 0 : index
    %c0_0 = arith.constant 0 : index
    %0 = vector.load %arg1[%c0, %c0_0] : memref<16x32xf32, #tpu.memory_space<vmem>>, vector<16x32xf32>
    %c0_1 = arith.constant 0 : index
    %c0_2 = arith.constant 0 : index
    %1 = vector.load %arg2[%c0_1, %c0_2] : memref<32x32xf32, #tpu.memory_space<vmem>>, vector<32x32xf32>
    %c0_3 = arith.constant 0 : index
    %c0_4 = arith.constant 0 : index
    %2 = vector.load %arg3[%c0_3, %c0_4] : memref<1x32xf32, #tpu.memory_space<vmem>>, vector<1x32xf32>
    %c0_5 = arith.constant 0 : index
    %c0_6 = arith.constant 0 : index
    %3 = vector.load %arg0[%c0_5, %c0_6] : memref<64x16xf32, #tpu.memory_space<vmem>>, vector<64x16xf32>
    %cst = arith.constant dense<0.000000e+00> : vector<64x32xf32>
    %4 = tpu.matmul %3, %0, %cst {dimension_numbers = #tpu.dot_dimension_numbers<[1], [0], [0], [1], [0, 0, 1, 1], [], []>} : vector<64x16xf32>, vector<16x32xf32>, vector<64x32xf32> -> vector<64x32xf32>
    %5 = vector.broadcast %2 : vector<1x32xf32> to vector<64x32xf32>
    %6 = arith.addf %4, %5 : vector<64x32xf32>
    %7 = vector.extract_strided_slice %6 {offsets = [0, 0], sizes = [8, 32], strides = [1, 1]} : vector<64x32xf32> to vector<8x32xf32>
    %8 = math.tanh %7 : vector<8x32xf32>
    %c0_7 = arith.constant 0 : index
    %c0_8 = arith.constant 0 : index
    %9 = vector.load %arg8[%c0_7, %c0_8] : memref<64x32xf32, #tpu.memory_space<vmem>>, vector<8x32xf32>
    tpu.vector_store %arg8[%c0_7, %c0_8], %8 {strides = array<i32>} : memref<64x32xf32, #tpu.memory_space<vmem>>, vector<8x32xf32>,
    %10 = vector.extract_strided_slice %6 {offsets = [8, 0], sizes = [8, 32], strides = [1, 1]} : vector<64x32xf32> to vector<8x32xf32>
    %cst_9 = arith.constant dense<0.000000e+00> : vector<8x32xf32>
    %11 = tpu.matmul %8, %1, %cst_9 {dimension_numbers = #tpu.dot_dimension_numbers<[1], [0], [0], [1], [0, 0, 1, 1], [], []>} : vector<8x32xf32>, vector<32x32xf32>, vector<8x32xf32> -> vector<8x32xf32>
    %12 = arith.addf %10, %11 : vector<8x32xf32>
    %13 = math.tanh %12 : vector<8x32xf32>
    %c8 = arith.constant 8 : index
    %c0_10 = arith.constant 0 : index
    %14 = vector.load %arg8[%c8, %c0_10] : memref<64x32xf32, #tpu.memory_space<vmem>>, vector<8x32xf32>
    tpu.vector_store %arg8[%c8, %c0_10], %13 {strides = array<i32>} : memref<64x32xf32, #tpu.memory_space<vmem>>, vector<8x32xf32>,
    %15 = vector.extract_strided_slice %6 {offsets = [16, 0], sizes = [8, 32], strides = [1, 1]} : vector<64x32xf32> to vector<8x32xf32>
    %cst_11 = arith.constant dense<0.000000e+00> : vector<8x32xf32>
    %16 = tpu.matmul %13, %1, %cst_11 {dimension_numbers = #tpu.dot_dimension_numbers<[1], [0], [0], [1], [0, 0, 1, 1], [], []>} : vector<8x32xf32>, vector<32x32xf32>, vector<8x32xf32> -> vector<8x32xf32>
    %17 = arith.addf %15, %16 : vector<8x32xf32>
    %18 = math.tanh %17 : vector<8x32xf32>
    %c16 = arith.constant 16 : index
    %c0_12 = arith.constant 0 : index
    %19 = vector.load %arg8[%c16, %c0_12] : memref<64x32xf32, #tpu.memory_space<vmem>>, vector<8x32xf32>
    tpu.vector_store %arg8[%c16, %c0_12], %18 {strides = array<i32>} : memref<64x32xf32, #tpu.memory_space<vmem>>, vector<8x32xf32>,
    %20 = vector.extract_strided_slice %6 {offsets = [24, 0], sizes = [8, 32], strides = [1, 1]} : vector<64x32xf32> to vector<8x32xf32>
    %cst_13 = arith.constant dense<0.000000e+00> : vector<8x32xf32>
    %21 = tpu.matmul %18, %1, %cst_13 {dimension_numbers = #tpu.dot_dimension_numbers<[1], [0], [0], [1], [0, 0, 1, 1], [], []>} : vector<8x32xf32>, vector<32x32xf32>, vector<8x32xf32> -> vector<8x32xf32>
    %22 = arith.addf %20, %21 : vector<8x32xf32>
    %23 = math.tanh %22 : vector<8x32xf32>
    %c24 = arith.constant 24 : index
    %c0_14 = arith.constant 0 : index
    %24 = vector.load %arg8[%c24, %c0_14] : memref<64x32xf32, #tpu.memory_space<vmem>>, vector<8x32xf32>
    tpu.vector_store %arg8[%c24, %c0_14], %23 {strides = array<i32>} : memref<64x32xf32, #tpu.memory_space<vmem>>, vector<8x32xf32>,
    %25 = vector.extract_strided_slice %6 {offsets = [32, 0], sizes = [8, 32], strides = [1, 1]} : vector<64x32xf32> to vector<8x32xf32>
    %cst_15 = arith.constant dense<0.000000e+00> : vector<8x32xf32>
    %26 = tpu.matmul %23, %1, %cst_15 {dimension_numbers = #tpu.dot_dimension_numbers<[1], [0], [0], [1], [0, 0, 1, 1], [], []>} : vector<8x32xf32>, vector<32x32xf32>, vector<8x32xf32> -> vector<8x32xf32>
    %27 = arith.addf %25, %26 : vector<8x32xf32>
    %28 = math.tanh %27 : vector<8x32xf32>
    %c32 = arith.constant 32 : index
    %c0_16 = arith.constant 0 : index
    %29 = vector.load %arg8[%c32, %c0_16] : memref<64x32xf32, #tpu.memory_space<vmem>>, vector<8x32xf32>
    tpu.vector_store %arg8[%c32, %c0_16], %28 {strides = array<i32>} : memref<64x32xf32, #tpu.memory_space<vmem>>, vector<8x32xf32>,
    %30 = vector.extract_strided_slice %6 {offsets = [40, 0], sizes = [8, 32], strides = [1, 1]} : vector<64x32xf32> to vector<8x32xf32>
    %cst_17 = arith.constant dense<0.000000e+00> : vector<8x32xf32>
    %31 = tpu.matmul %28, %1, %cst_17 {dimension_numbers = #tpu.dot_dimension_numbers<[1], [0], [0], [1], [0, 0, 1, 1], [], []>} : vector<8x32xf32>, vector<32x32xf32>, vector<8x32xf32> -> vector<8x32xf32>
    %32 = arith.addf %30, %31 : vector<8x32xf32>
    %33 = math.tanh %32 : vector<8x32xf32>
    %c40 = arith.constant 40 : index
    %c0_18 = arith.constant 0 : index
    %34 = vector.load %arg8[%c40, %c0_18] : memref<64x32xf32, #tpu.memory_space<vmem>>, vector<8x32xf32>
    tpu.vector_store %arg8[%c40, %c0_18], %33 {strides = array<i32>} : memref<64x32xf32, #tpu.memory_space<vmem>>, vector<8x32xf32>,
    %35 = vector.extract_strided_slice %6 {offsets = [48, 0], sizes = [8, 32], strides = [1, 1]} : vector<64x32xf32> to vector<8x32xf32>
    %cst_19 = arith.constant dense<0.000000e+00> : vector<8x32xf32>
    %36 = tpu.matmul %33, %1, %cst_19 {dimension_numbers = #tpu.dot_dimension_numbers<[1], [0], [0], [1], [0, 0, 1, 1], [], []>} : vector<8x32xf32>, vector<32x32xf32>, vector<8x32xf32> -> vector<8x32xf32>
    %37 = arith.addf %35, %36 : vector<8x32xf32>
    %38 = math.tanh %37 : vector<8x32xf32>
    %c48 = arith.constant 48 : index
    %c0_20 = arith.constant 0 : index
    %39 = vector.load %arg8[%c48, %c0_20] : memref<64x32xf32, #tpu.memory_space<vmem>>, vector<8x32xf32>
    tpu.vector_store %arg8[%c48, %c0_20], %38 {strides = array<i32>} : memref<64x32xf32, #tpu.memory_space<vmem>>, vector<8x32xf32>,
    %40 = vector.extract_strided_slice %6 {offsets = [56, 0], sizes = [8, 32], strides = [1, 1]} : vector<64x32xf32> to vector<8x32xf32>
    %cst_21 = arith.constant dense<0.000000e+00> : vector<8x32xf32>
    %41 = tpu.matmul %38, %1, %cst_21 {dimension_numbers = #tpu.dot_dimension_numbers<[1], [0], [0], [1], [0, 0, 1, 1], [], []>} : vector<8x32xf32>, vector<32x32xf32>, vector<8x32xf32> -> vector<8x32xf32>
    %42 = arith.addf %40, %41 : vector<8x32xf32>
    %43 = math.tanh %42 : vector<8x32xf32>
    %c56 = arith.constant 56 : index
    %c0_22 = arith.constant 0 : index
    %44 = vector.load %arg8[%c56, %c0_22] : memref<64x32xf32, #tpu.memory_space<vmem>>, vector<8x32xf32>
    tpu.vector_store %arg8[%c56, %c0_22], %43 {strides = array<i32>} : memref<64x32xf32, #tpu.memory_space<vmem>>, vector<8x32xf32>,
    %c0_23 = arith.constant 0 : index
    %c0_24 = arith.constant 0 : index
    %45 = vector.load %arg4[%c0_23, %c0_24] : memref<32x32xf32, #tpu.memory_space<vmem>>, vector<32x32xf32>
    %c0_25 = arith.constant 0 : index
    %c0_26 = arith.constant 0 : index
    %46 = vector.load %arg5[%c0_25, %c0_26] : memref<32x32xf32, #tpu.memory_space<vmem>>, vector<32x32xf32>
    %c0_27 = arith.constant 0 : index
    %c0_28 = arith.constant 0 : index
    %47 = vector.load %arg6[%c0_27, %c0_28] : memref<1x32xf32, #tpu.memory_space<vmem>>, vector<1x32xf32>
    %c0_29 = arith.constant 0 : index
    %c0_30 = arith.constant 0 : index
    %48 = vector.load %arg8[%c0_29, %c0_30] : memref<64x32xf32, #tpu.memory_space<vmem>>, vector<64x32xf32>
    %cst_31 = arith.constant dense<0.000000e+00> : vector<64x32xf32>
    %49 = tpu.matmul %48, %45, %cst_31 {dimension_numbers = #tpu.dot_dimension_numbers<[1], [0], [0], [1], [0, 0, 1, 1], [], []>} : vector<64x32xf32>, vector<32x32xf32>, vector<64x32xf32> -> vector<64x32xf32>
    %50 = vector.broadcast %47 : vector<1x32xf32> to vector<64x32xf32>
    %51 = arith.addf %49, %50 : vector<64x32xf32>
    %52 = vector.extract_strided_slice %51 {offsets = [0, 0], sizes = [8, 32], strides = [1, 1]} : vector<64x32xf32> to vector<8x32xf32>
    %53 = math.tanh %52 : vector<8x32xf32>
    %54 = vector.extract_strided_slice %51 {offsets = [8, 0], sizes = [8, 32], strides = [1, 1]} : vector<64x32xf32> to vector<8x32xf32>
    %cst_32 = arith.constant dense<0.000000e+00> : vector<8x32xf32>
    %55 = tpu.matmul %53, %46, %cst_32 {dimension_numbers = #tpu.dot_dimension_numbers<[1], [0], [0], [1], [0, 0, 1, 1], [], []>} : vector<8x32xf32>, vector<32x32xf32>, vector<8x32xf32> -> vector<8x32xf32>
    %56 = arith.addf %54, %55 : vector<8x32xf32>
    %57 = math.tanh %56 : vector<8x32xf32>
    %58 = vector.extract_strided_slice %51 {offsets = [16, 0], sizes = [8, 32], strides = [1, 1]} : vector<64x32xf32> to vector<8x32xf32>
    %cst_33 = arith.constant dense<0.000000e+00> : vector<8x32xf32>
    %59 = tpu.matmul %57, %46, %cst_33 {dimension_numbers = #tpu.dot_dimension_numbers<[1], [0], [0], [1], [0, 0, 1, 1], [], []>} : vector<8x32xf32>, vector<32x32xf32>, vector<8x32xf32> -> vector<8x32xf32>
    %60 = arith.addf %58, %59 : vector<8x32xf32>
    %61 = math.tanh %60 : vector<8x32xf32>
    %62 = vector.extract_strided_slice %51 {offsets = [24, 0], sizes = [8, 32], strides = [1, 1]} : vector<64x32xf32> to vector<8x32xf32>
    %cst_34 = arith.constant dense<0.000000e+00> : vector<8x32xf32>
    %63 = tpu.matmul %61, %46, %cst_34 {dimension_numbers = #tpu.dot_dimension_numbers<[1], [0], [0], [1], [0, 0, 1, 1], [], []>} : vector<8x32xf32>, vector<32x32xf32>, vector<8x32xf32> -> vector<8x32xf32>
    %64 = arith.addf %62, %63 : vector<8x32xf32>
    %65 = math.tanh %64 : vector<8x32xf32>
    %66 = vector.extract_strided_slice %51 {offsets = [32, 0], sizes = [8, 32], strides = [1, 1]} : vector<64x32xf32> to vector<8x32xf32>
    %cst_35 = arith.constant dense<0.000000e+00> : vector<8x32xf32>
    %67 = tpu.matmul %65, %46, %cst_35 {dimension_numbers = #tpu.dot_dimension_numbers<[1], [0], [0], [1], [0, 0, 1, 1], [], []>} : vector<8x32xf32>, vector<32x32xf32>, vector<8x32xf32> -> vector<8x32xf32>
    %68 = arith.addf %66, %67 : vector<8x32xf32>
    %69 = math.tanh %68 : vector<8x32xf32>
    %70 = vector.extract_strided_slice %51 {offsets = [40, 0], sizes = [8, 32], strides = [1, 1]} : vector<64x32xf32> to vector<8x32xf32>
    %cst_36 = arith.constant dense<0.000000e+00> : vector<8x32xf32>
    %71 = tpu.matmul %69, %46, %cst_36 {dimension_numbers = #tpu.dot_dimension_numbers<[1], [0], [0], [1], [0, 0, 1, 1], [], []>} : vector<8x32xf32>, vector<32x32xf32>, vector<8x32xf32> -> vector<8x32xf32>
    %72 = arith.addf %70, %71 : vector<8x32xf32>
    %73 = math.tanh %72 : vector<8x32xf32>
    %74 = vector.extract_strided_slice %51 {offsets = [48, 0], sizes = [8, 32], strides = [1, 1]} : vector<64x32xf32> to vector<8x32xf32>
    %cst_37 = arith.constant dense<0.000000e+00> : vector<8x32xf32>
    %75 = tpu.matmul %73, %46, %cst_37 {dimension_numbers = #tpu.dot_dimension_numbers<[1], [0], [0], [1], [0, 0, 1, 1], [], []>} : vector<8x32xf32>, vector<32x32xf32>, vector<8x32xf32> -> vector<8x32xf32>
    %76 = arith.addf %74, %75 : vector<8x32xf32>
    %77 = math.tanh %76 : vector<8x32xf32>
    %78 = vector.extract_strided_slice %51 {offsets = [56, 0], sizes = [8, 32], strides = [1, 1]} : vector<64x32xf32> to vector<8x32xf32>
    %cst_38 = arith.constant dense<0.000000e+00> : vector<8x32xf32>
    %79 = tpu.matmul %77, %46, %cst_38 {dimension_numbers = #tpu.dot_dimension_numbers<[1], [0], [0], [1], [0, 0, 1, 1], [], []>} : vector<8x32xf32>, vector<32x32xf32>, vector<8x32xf32> -> vector<8x32xf32>
    %80 = arith.addf %78, %79 : vector<8x32xf32>
    %81 = math.tanh %80 : vector<8x32xf32>
    %c0_39 = arith.constant 0 : index
    %c0_40 = arith.constant 0 : index
    %82 = vector.load %arg7[%c0_39, %c0_40] : memref<8x32xf32, #tpu.memory_space<vmem>>, vector<8x32xf32>
    tpu.vector_store %arg7[%c0_39, %c0_40], %81 {strides = array<i32>} : memref<8x32xf32, #tpu.memory_space<vmem>>, vector<8x32xf32>,
    return
  }
}

</mosaic_0001>

<bundles_post_ra>
// kernel: masked_deep_rnn_forward.1
= control target key start
LH: loop header
LB: loop body
LE: loop exit
PB: predicated region body
PF: predicated region fallthrough
CT: control target
= control target key end

     0   :  { %vm48_vm0 = vcmask 130048   ;;  %s2164_s0 = inlined_call_operand.vmem [shape: f32[64,16], index: 0, kind: input, shape index: {}]   ;;  %s2165_s1 = inlined_call_operand.vmem [shape: f32[16,32], index: 1, kind: input, shape index: {}]   ;;  %s2166_s2 = inlined_call_operand.vmem [shape: f32[32,32], index: 2, kind: input, shape index: {}]   ;;  %s2167_s3 = inlined_call_operand.vmem [shape: f32[1,32], index: 3, kind: input, shape index: {}]   ;;  %s2168_s4 = inlined_call_operand.vmem [shape: f32[32,32], index: 4, kind: input, shape index: {}]   ;;  %s2169_s5 = inlined_call_operand.vmem [shape: f32[32,32], index: 5, kind: input, shape index: {}]   ;;  %s2170_s6 = inlined_call_operand.vmem [shape: f32[1,32], index: 6, kind: input, shape index: {}]   ;;  %s2171_s7 = inlined_call_operand.hbm [shape: f32[8,32], index: 7, kind: output, shape index: {}]  }
   0x1   :  { %v27_v0 = vld [vmem:[%s2165_s1] sm:$0xff]  ;;  %v28_v1 = vld [vmem:[%s2165_s1 + $0x8] sm:$0xff] }
   0x2   :  { %v34_v2 = vld [vmem:[%s2164_s0] sm:$0xff]  ;;  %v1720_v3 = vpack.c.bf16 %v28_v1, %v27_v0 }
   0x3   :  { %1534 = vmatprep.mubr.msk.f32.mxu0 %vm48_vm0, %v34_v2 }
   0x4   :  { %12 = vsyncpa [#allocation4], 0  ;;  %1721 = vmatprep.subr.bf16.mxu0 %v1720_v3  ;;  %v35_v4 = vld [vmem:[%s2164_s0 + $0x8] sm:$0xff]  ;;  %v29_v5 = vld [vmem:[%s2166_s2] sm:$0xff]  ;;  %v1876_v8 = vmov 0.0|0.0   ;;  %vm1877_vm1 = vmmov 0  }
   0x5   :  { %1723 = vmatpush3.bf16.msra.mxu0 %v1720_v3  ;;  %v30_v6 = vld [vmem:[%s2166_s2 + $0x8] sm:$0xff]  ;;  %1724 = vmatprep.subr.bf16.mxu1 %v1876_v8  ;;  %v31_v9 = vld [vmem:[%s2166_s2 + $0x10] sm:$0xff]  ;;  %v32_v10 = vld [vmem:[%s2166_s2 + $0x18] sm:$0xff]  ;;  %v1878_v12 = vmov 0.0   ;;  %vm179_vm2 = vcmask 261120  }
   0x6   :  { %v1940_v7 = vpack.c.bf16 %v30_v6, %v29_v5  ;;  %1736 = vmatprep.subr.bf16.mxu0 %v1876_v8  ;;  %v1954_v11 = vpack.c.bf16 %v32_v10, %v31_v9  ;;  %1554 = vmatprep.mubr.msk.f32.mxu1 %vm1877_vm1, %v1878_v12  ;;  %v1965_v13 = vld [vmem:[%s2167_s3] ss:$0 sm:$0xff]  ;;  %v36_v18 = vld [vmem:[%s2164_s0 + $0x10] sm:$0xff]  ;;  %v37_v19 = vld [vmem:[%s2164_s0 + $0x18] sm:$0xff] }
   0x7   :  { %v38_v27 = vld [vmem:[%s2164_s0 + $0x20] sm:$0xff]  ;;  %v39_v28 = vld [vmem:[%s2164_s0 + $0x28] sm:$0xff]  ;;  %v40_v29 = vld [vmem:[%s2164_s0 + $0x30] sm:$0xff] }
   0x8   :  { %1535 = vmatmul.mubr.msk.f32.vlgmr.msra.gmra.mrb[0].mxu0 %vm48_vm0, %v35_v4  ;;  %1726 = vmatpush3.bf16.msra.mxu1 %v1940_v7  ;;  %v41_v30 = vld [vmem:[%s2164_s0 + $0x38] sm:$0xff]  ;;  %v713_v50 = vld [vmem:[%s2168_s4] sm:$0xff]  ;;  %v714_v51 = vld [vmem:[%s2168_s4 + $0x8] sm:$0xff] }
   0x9   :  { %1738 = vmatpush3.bf16.msra.mxu0 %v1940_v7  ;;  %1727 = vmatprep.subr.bf16.mxu1 %v1876_v8  ;;  %v1766_v52 = vpack.c.bf16 %v714_v51, %v713_v50  ;;  %v715_v57 = vld [vmem:[%s2168_s4 + $0x10] sm:$0xff]  ;;  %v716_v58 = vld [vmem:[%s2168_s4 + $0x18] sm:$0xff]  ;;  %v717_v3 = vld [vmem:[%s2169_s5] sm:$0xff] }
   0xa   :  { %1739 = vmatprep.subr.bf16.mxu0 %v1876_v8  ;;  %1537 = vmatprep.mubr.msk.f32.mxu0 %vm48_vm0, %v36_v18  ;;  %v1770_v59 = vpack.c.bf16 %v716_v58, %v715_v57  ;;  %v718_v4 = vld [vmem:[%s2169_s5 + $0x8] sm:$0xff]  ;;  %v719_v6 = vld [vmem:[%s2169_s5 + $0x10] sm:$0xff] }
   0xb   :  { %v2069_v5 = vpack.c.bf16 %v718_v4, %v717_v3 }
   0xc   :  { %1729 = vmatpush3.bf16.msra.mxu1 %v1954_v11  ;;  %1538 = vmatmul.mubr.msk.f32.gmra.mrb[2].mxu0 %vm48_vm0, %v37_v19 }
   0xd   :  { %1741 = vmatpush3.bf16.msra.mxu0 %v1954_v11  ;;  %1730 = vmatprep.subr.bf16.mxu1 %v1876_v8 }
   0xe   :  { %1748 = vmatprep.subr.bf16.mxu0 %v1876_v8  ;;  %1540 = vmatprep.mubr.msk.f32.mxu0 %vm48_vm0, %v38_v27 }
  0x10   :  { %1541 = vmatmul.mubr.msk.f32.gmra.mrb[4].mxu0 %vm48_vm0, %v39_v28 }
  0x11   :  { %1543 = vmatprep.mubr.msk.f32.mxu0 %vm48_vm0, %v40_v29 }
  0x14   :  { %1544 = vmatmul.mubr.msk.f32.gmra.mrb[6].mxu0 %vm48_vm0, %v41_v30 }
  0x15   :  { %1576 = vmatprep.mubr.msk.f32.mxu0 %vm1877_vm1, %v1878_v12 }
  0xdb   :  { %v1536_v14 = vpop.f32.mrb[0].mxu0 }
  0xdc   :  { %v139_v15 = vpop.f32.mrb[1].mxu0  ;;  %v145_v20 = vadd.f32 %v1536_v14, %v1965_v13 }
  0xdd   :  { %v140_v16 = vadd.f32 %v1965_v13, %v139_v15 }
  0xdf   :  { %1820 = vtanh.f32 %v140_v16  ;;  %v1539_v25 = vpop.f32.mrb[2].mxu0  ;;  %v2088_v16 = vld [vmem:[%s2170_s6] ss:$0 sm:$0xff] }
  0xe0   :  { %v149_v26 = vpop.f32.mrb[3].mxu0  ;;  %v155_v40 = vadd.f32 %v1539_v25, %v1965_v13 }
  0xe1   :  { %v150_v31 = vadd.f32 %v1965_v13, %v149_v26 }
  0xe3   :  { %v1542_v36 = vpop.f32.mrb[4].mxu0 }
  0xe4   :  { %v159_v37 = vpop.f32.mrb[5].mxu0  ;;  %v165_v53 = vadd.f32 %v1542_v36, %v1965_v13 }
  0xe5   :  { %v160_v45 = vadd.f32 %v1965_v13, %v159_v37 }
  0xe7   :  { %v2020_v38 = vpop.f32.mrb[6].mxu0 }
  0xe8   :  { %v2022_v39 = vpop.f32.mrb[7].mxu0  ;;  %v175_v27 = vadd.f32 %v2020_v38, %v1965_v13 }
  0xe9   :  { %v1821_v17 = vpop.eup %1820  ;;  %v170_v10 = vadd.f32 %v1965_v13, %v2022_v39 }
  0xea   :  { %180 = vst.msk [vmem:[#allocation2] sm:$0xff] %vm179_vm2, %v1821_v17  ;;  %1555 = vmatmul.mubr.msk.f32.vlgmr.msra.gmra.mrb[0].mxu1 %vm179_vm2, %v1821_v17 }
  0xeb   :  { %1732 = vmatpush3.bf16.msra.mxu1 %v1940_v7  ;;  %1565 = vmatprep.mubr.msk.f32.mxu1 %vm1877_vm1, %v1878_v12 }
  0xec   :  { %1733 = vmatprep.subr.bf16.mxu1 %v1876_v8 }
  0xef   :  { %1735 = vmatpush3.bf16.msra.mxu1 %v1954_v11 }
  0xf0   :  { %1742 = vmatprep.subr.bf16.mxu1 %v1876_v8 }
  0xf1   :  { %v722_v61 = vld [vmem:[#allocation2] sm:$0xff] }
 0x1bd   :  { %v250_v21 = vpop.f32.mrb[0].mxu1 }
 0x1be   :  { %v254_v22 = vadd.f32 %v250_v21, %v145_v20  ;;  %v1556_v23 = vpop.f32.mrb[1].mxu1 }
 0x1c0   :  { %1822 = vtanh.f32 %v254_v22 }
 0x1ca   :  { %v1823_v24 = vpop.eup %1822 }
 0x1cb   :  { %256 = vst.msk [vmem:[#allocation2 + $0x8] sm:$0xff] %vm179_vm2, %v1823_v24  ;;  %1566 = vmatmul.mubr.msk.f32.vlgmr.msra.gmra.mrb[2].mxu1 %vm179_vm2, %v1823_v24 }
 0x1cc   :  { %1744 = vmatpush3.bf16.msra.mxu1 %v1940_v7  ;;  %1587 = vmatprep.mubr.msk.f32.mxu1 %vm1877_vm1, %v1878_v12 }
 0x1cd   :  { %1745 = vmatprep.subr.bf16.mxu1 %v1876_v8 }
 0x1d0   :  { %1747 = vmatpush3.bf16.msra.mxu1 %v1954_v11 }
 0x1d1   :  { %1754 = vmatprep.subr.bf16.mxu1 %v1876_v8 }
 0x1d2   :  { %v723_v62 = vld [vmem:[#allocation2 + $0x8] sm:$0xff] }
 0x29e   :  { %v326_v32 = vpop.f32.mrb[2].mxu1 }
 0x29f   :  { %v330_v33 = vadd.f32 %v326_v32, %v150_v31  ;;  %v1567_v34 = vpop.f32.mrb[3].mxu1 }
 0x2a1   :  { %1824 = vtanh.f32 %v330_v33 }
 0x2ab   :  { %v1825_v35 = vpop.eup %1824 }
 0x2ac   :  { %332 = vst.msk [vmem:[#allocation2 + $0x10] sm:$0xff] %vm179_vm2, %v1825_v35  ;;  %1577 = vmatmul.mubr.msk.f32.vlgmr.msra.gmra.mrb[8].mxu0 %vm179_vm2, %v1825_v35 }
 0x2ad   :  { %1750 = vmatpush3.bf16.msra.mxu0 %v1940_v7  ;;  %1598 = vmatprep.mubr.msk.f32.mxu0 %vm1877_vm1, %v1878_v12 }
 0x2ae   :  { %1751 = vmatprep.subr.bf16.mxu0 %v1876_v8 }
 0x2b1   :  { %1753 = vmatpush3.bf16.msra.mxu0 %v1954_v11 }
 0x2b2   :  { %1760 = vmatprep.subr.bf16.mxu0 %v1876_v8 }
 0x2b3   :  { %v724_v63 = vld [vmem:[#allocation2 + $0x10] sm:$0xff] }
 0x37f   :  { %v402_v41 = vpop.f32.mrb[8].mxu0 }
 0x380   :  { %v406_v42 = vadd.f32 %v402_v41, %v155_v40  ;;  %v1578_v43 = vpop.f32.mrb[9].mxu0 }
 0x382   :  { %1826 = vtanh.f32 %v406_v42 }
 0x38c   :  { %v1827_v44 = vpop.eup %1826 }
 0x38d   :  { %408 = vst.msk [vmem:[#allocation2 + $0x18] sm:$0xff] %vm179_vm2, %v1827_v44  ;;  %1588 = vmatmul.mubr.msk.f32.vlgmr.msra.gmra.mrb[4].mxu1 %vm179_vm2, %v1827_v44 }
 0x38e   :  { %1756 = vmatpush3.bf16.msra.mxu1 %v1940_v7  ;;  %1609 = vmatprep.mubr.msk.f32.mxu1 %vm1877_vm1, %v1878_v12 }
 0x38f   :  { %1757 = vmatprep.subr.bf16.mxu1 %v1876_v8 }
 0x392   :  { %1759 = vmatpush3.bf16.msra.mxu1 %v1954_v11 }
 0x393   :  { %1767 = vmatprep.subr.bf16.mxu1 %v1766_v52 }
 0x394   :  { %v725_v0 = vld [vmem:[#allocation2 + $0x18] sm:$0xff] }
 0x460   :  { %v478_v46 = vpop.f32.mrb[4].mxu1 }
 0x461   :  { %v482_v47 = vadd.f32 %v478_v46, %v160_v45  ;;  %v1589_v48 = vpop.f32.mrb[5].mxu1 }
 0x463   :  { %1828 = vtanh.f32 %v482_v47 }
 0x46d   :  { %v1829_v49 = vpop.eup %1828 }
 0x46e   :  { %484 = vst.msk [vmem:[#allocation2 + $0x20] sm:$0xff] %vm179_vm2, %v1829_v49  ;;  %1599 = vmatmul.mubr.msk.f32.vlgmr.msra.gmra.mrb[10].mxu0 %vm179_vm2, %v1829_v49 }
 0x46f   :  { %1762 = vmatpush3.bf16.msra.mxu0 %v1940_v7  ;;  %1620 = vmatprep.mubr.msk.f32.mxu0 %vm1877_vm1, %v1878_v12  ;;  %v720_v7 = vld [vmem:[%s2169_s5 + $0x18] sm:$0xff]  ;;  %s1879_s5 = smov [#allocation3]  }
 0x470   :  { %1763 = vmatprep.subr.bf16.mxu0 %v1876_v8  ;;  %v2079_v9 = vpack.c.bf16 %v720_v7, %v719_v6  ;;  %s1398_s6 = sshll.u32 %s1879_s5, 4  ;;  %s1399_s6 = int_to_ptr.vmem [resolvable:$true] %s1398_s6 }
 0x471   :  { %s1852_s18 = scalar_lea.vmem %s1399_s6, 128  ;;  %p1857_p1 = scmp.lt.s32.totalorder %s1399_s6, %s1399_s6 }
 0x472   :  { %p1853_p0 = scmp.ne.s32.totalorder %s1399_s6, %s1852_s18  ;;  %p1858_p2 = scmp.lt.s32.totalorder %s1852_s18, %s1852_s18 }
 0x473   :  { %1765 = vmatpush3.bf16.msra.mxu0 %v1954_v11 }
 0x474   :  { %1774 = vmatprep.subr.bf16.mxu0 %v1876_v8  ;;  %p1859_p3 = por %p1858_p2, %p1857_p1 }
 0x475   :  { %v726_v1 = vld [vmem:[#allocation2 + $0x20] sm:$0xff] }
 0x476   :  { %p1860_p4 = pnand %p1859_p3, %p1853_p0 }
 0x541   :  { %v554_v54 = vpop.f32.mrb[10].mxu0 }
 0x542   :  { %v558_v55 = vadd.f32 %v554_v54, %v165_v53  ;;  %v1600_v56 = vpop.f32.mrb[11].mxu0 }
 0x544   :  { %1830 = vtanh.f32 %v558_v55 }
 0x54e   :  { %v1831_v60 = vpop.eup %1830 }
 0x54f   :  { %560 = vst.msk [vmem:[#allocation2 + $0x28] sm:$0xff] %vm179_vm2, %v1831_v60  ;;  %1610 = vmatmul.mubr.msk.f32.vlgmr.msra.gmra.mrb[6].mxu1 %vm179_vm2, %v1831_v60 }
 0x550   :  { %1769 = vmatpush3.bf16.msra.mxu1 %v1766_v52  ;;  %1631 = vmatprep.mubr.msk.f32.mxu1 %vm179_vm2, %v722_v61 }
 0x551   :  { %1771 = vmatprep.subr.bf16.mxu1 %v1770_v59 }
 0x554   :  { %1773 = vmatpush3.bf16.msra.mxu1 %v1770_v59 }
 0x555   :  { %1786 = vmatprep.subr.bf16.mxu1 %v1876_v8 }
 0x556   :  { %v727_v2 = vld [vmem:[#allocation2 + $0x28] sm:$0xff] }
 0x557   :  { %1632 = vmatmul.mubr.msk.f32.vlgmr.msra.gmra.mrb[8].mxu1 %vm179_vm2, %v723_v62 }
 0x558   :  { %1634 = vmatprep.mubr.msk.f32.mxu1 %vm179_vm2, %v724_v63  ;;  %1788 = vmatpush3.bf16.msra.mxu1 %v2069_v5 }
 0x559   :  { %1789 = vmatprep.subr.bf16.mxu1 %v1876_v8 }
 0x55b   :  { %1635 = vmatmul.mubr.msk.f32.gmra.mrb[10].mxu1 %vm179_vm2, %v725_v0 }
 0x55c   :  { %1637 = vmatprep.mubr.msk.f32.mxu1 %vm179_vm2, %v726_v1  ;;  %1791 = vmatpush3.bf16.msra.mxu1 %v2079_v9 }
 0x55d   :  { %1798 = vmatprep.subr.bf16.mxu1 %v1876_v8 }
 0x55f   :  { %1638 = vmatmul.mubr.msk.f32.gmra.mrb[12].mxu1 %vm179_vm2, %v727_v2 }
 0x622   :  { %v630_v11 = vpop.f32.mrb[6].mxu1 }
 0x623   :  { %v634_v14 = vadd.f32 %v630_v11, %v170_v10  ;;  %v1611_v15 = vpop.f32.mrb[7].mxu1 }
 0x625   :  { %1832 = vtanh.f32 %v634_v14 }
 0x62a   :  { %v1633_v17 = vpop.f32.mrb[8].mxu1 }
 0x62b   :  { %v826_v18 = vpop.f32.mrb[9].mxu1  ;;  %v832_v31 = vadd.f32 %v1633_v17, %v2088_v16 }
 0x62c   :  { %v827_v19 = vadd.f32 %v2088_v16, %v826_v18 }
 0x62e   :  { %1834 = vtanh.f32 %v827_v19  ;;  %v1636_v20 = vpop.f32.mrb[10].mxu1 }
 0x62f   :  { %v1833_v21 = vpop.eup %1832  ;;  %v836_v22 = vpop.f32.mrb[11].mxu1  ;;  %v842_v44 = vadd.f32 %v1636_v20, %v2088_v16 }
 0x630   :  { %636 = vst.msk [vmem:[#allocation2 + $0x30] sm:$0xff] %vm179_vm2, %v1833_v21  ;;  %1621 = vmatmul.mubr.msk.f32.vlgmr.msra.gmra.mrb[12].mxu0 %vm179_vm2, %v1833_v21  ;;  %v837_v13 = vadd.f32 %v2088_v16, %v836_v22 }
 0x631   :  { %1776 = vmatpush3.bf16.msra.mxu0 %v2069_v5  ;;  %1651 = vmatprep.mubr.msk.f32.mxu0 %vm1877_vm1, %v1878_v12 }
 0x632   :  { %v2096_v23 = vpop.f32.mrb[12].mxu1  ;;  %1777 = vmatprep.subr.bf16.mxu0 %v1876_v8 }
 0x633   :  { %v846_v24 = vpop.f32.mrb[13].mxu1  ;;  %v852_v54 = vadd.f32 %v2096_v23, %v2088_v16 }
 0x634   :  { %v847_v49 = vadd.f32 %v2088_v16, %v846_v24 }
 0x635   :  { %1779 = vmatpush3.bf16.msra.mxu0 %v2079_v9 }
 0x636   :  { %1780 = vmatprep.subr.bf16.mxu0 %v1876_v8 }
 0x637   :  { %v728_v25 = vld [vmem:[#allocation2 + $0x30] sm:$0xff] }
 0x638   :  { %v1835_v26 = vpop.eup %1834  ;;  %1640 = vmatprep.mubr.msk.f32.mxu1 %vm179_vm2, %v728_v25 }
 0x639   :  { %1652 = vmatmul.mubr.msk.f32.vlgmr.msra.gmra.mrb[14].mxu0 %vm179_vm2, %v1835_v26 }
 0x63a   :  { %1782 = vmatpush3.bf16.msra.mxu0 %v2069_v5  ;;  %1662 = vmatprep.mubr.msk.f32.mxu0 %vm1877_vm1, %v1878_v12 }
 0x63b   :  { %1783 = vmatprep.subr.bf16.mxu0 %v1876_v8 }
 0x63e   :  { %1785 = vmatpush3.bf16.msra.mxu0 %v2079_v9 }
 0x63f   :  { %1792 = vmatprep.subr.bf16.mxu0 %v1876_v8 }
 0x703   :  { %v706_v28 = vpop.f32.mrb[12].mxu0 }
 0x704   :  { %v710_v29 = vadd.f32 %v706_v28, %v175_v27  ;;  %v1622_v30 = vpop.f32.mrb[13].mxu0 }
 0x706   :  { %1836 = vtanh.f32 %v710_v29 }
 0x70c   :  { %v935_v32 = vpop.f32.mrb[14].mxu0 }
 0x70d   :  { %v939_v33 = vadd.f32 %v935_v32, %v832_v31  ;;  %v1653_v34 = vpop.f32.mrb[15].mxu0 }
 0x70f   :  { %1838 = vtanh.f32 %v939_v33 }
 0x710   :  { %v1837_v35 = vpop.eup %1836 }
 0x711   :  { %712 = vst.msk [vmem:[#allocation2 + $0x38] sm:$0xff] %vm179_vm2, %v1837_v35 }
 0x718   :  { %v729_v36 = vld [vmem:[#allocation2 + $0x38] sm:$0xff] }
 0x719   :  { %v1839_v37 = vpop.eup %1838  ;;  %1641 = vmatmul.mubr.msk.f32.gmra.mrb[14].mxu1 %vm179_vm2, %v729_v36 }
 0x71a   :  { %1663 = vmatmul.mubr.msk.f32.vlgmr.msra.gmra.mrb[16].mxu0 %vm179_vm2, %v1839_v37  ;;  %1673 = vmatprep.mubr.msk.f32.mxu1 %vm1877_vm1, %v1878_v12 }
 0x71b   :  { %1794 = vmatpush3.bf16.msra.mxu0 %v2069_v5  ;;  %1684 = vmatprep.mubr.msk.f32.mxu0 %vm1877_vm1, %v1878_v12 }
 0x71c   :  { %1795 = vmatprep.subr.bf16.mxu0 %v1876_v8 }
 0x71f   :  { %1797 = vmatpush3.bf16.msra.mxu0 %v2079_v9 }
 0x720   :  { %1804 = vmatprep.subr.bf16.mxu0 %v1876_v8 }
 0x7ec   :  { %v1642_v38 = vpop.f32.mrb[14].mxu1 }
 0x7ed   :  { %v1010_v39 = vpop.f32.mrb[16].mxu0  ;;  %v856_v40 = vpop.f32.mrb[15].mxu1 }
 0x7ee   :  { %v1014_v41 = vadd.f32 %v1010_v39, %v837_v13  ;;  %v1664_v42 = vpop.f32.mrb[17].mxu0  ;;  %v857_v59 = vadd.f32 %v2088_v16, %v856_v40 }
 0x7f0   :  { %1840 = vtanh.f32 %v1014_v41 }
 0x7fa   :  { %v1841_v43 = vpop.eup %1840 }
 0x7fb   :  { %1674 = vmatmul.mubr.msk.f32.vlgmr.msra.gmra.mrb[16].mxu1 %vm179_vm2, %v1841_v43 }
 0x7fc   :  { %1800 = vmatpush3.bf16.msra.mxu1 %v2069_v5  ;;  %1695 = vmatprep.mubr.msk.f32.mxu1 %vm1877_vm1, %v1878_v12 }
 0x7fd   :  { %1801 = vmatprep.subr.bf16.mxu1 %v1876_v8 }
 0x800   :  { %1803 = vmatpush3.bf16.msra.mxu1 %v2079_v9 }
 0x801   :  { %1810 = vmatprep.subr.bf16.mxu1 %v1876_v8 }
 0x8ce   :  { %v1085_v45 = vpop.f32.mrb[16].mxu1 }
 0x8cf   :  { %v1089_v46 = vadd.f32 %v1085_v45, %v842_v44  ;;  %v1675_v47 = vpop.f32.mrb[17].mxu1 }
 0x8d1   :  { %1842 = vtanh.f32 %v1089_v46 }
 0x8db   :  { %v1843_v48 = vpop.eup %1842 }
 0x8dc   :  { %1685 = vmatmul.mubr.msk.f32.vlgmr.msra.gmra.mrb[18].mxu0 %vm179_vm2, %v1843_v48 }
 0x8dd   :  { %1806 = vmatpush3.bf16.msra.mxu0 %v2069_v5  ;;  %1706 = vmatprep.mubr.msk.f32.mxu0 %vm1877_vm1, %v1878_v12 }
 0x8de   :  { %1807 = vmatprep.subr.bf16.mxu0 %v1876_v8 }
 0x8e1   :  { %1809 = vmatpush3.bf16.msra.mxu0 %v2079_v9 }
 0x9af   :  { %v1160_v50 = vpop.f32.mrb[18].mxu0 }
 0x9b0   :  { %v1164_v51 = vadd.f32 %v1160_v50, %v847_v49  ;;  %v1686_v52 = vpop.f32.mrb[19].mxu0 }
 0x9b2   :  { %1844 = vtanh.f32 %v1164_v51 }
 0x9bc   :  { %v1845_v53 = vpop.eup %1844 }
 0x9bd   :  { %1696 = vmatmul.mubr.msk.f32.vlgmr.msra.gmra.mrb[18].mxu1 %vm179_vm2, %v1845_v53 }
 0x9be   :  { %1812 = vmatpush3.bf16.msra.mxu1 %v2069_v5  ;;  %1717 = vmatprep.mubr.msk.f32.mxu1 %vm1877_vm1, %v1878_v12 }
 0x9bf   :  { %1813 = vmatprep.subr.bf16.mxu1 %v1876_v8  ;;  %v862_v8 = vadd.f32 %v1642_v38, %v2088_v16 }
 0x9c2   :  { %1815 = vmatpush3.bf16.msra.mxu1 %v2079_v9 }
 0xa90   :  { %v1235_v55 = vpop.f32.mrb[18].mxu1 }
 0xa91   :  { %v1239_v56 = vadd.f32 %v1235_v55, %v852_v54  ;;  %v1697_v57 = vpop.f32.mrb[19].mxu1 }
 0xa93   :  { %1846 = vtanh.f32 %v1239_v56 }
 0xa9d   :  { %v1847_v58 = vpop.eup %1846 }
 0xa9e   :  { %1707 = vmatmul.mubr.msk.f32.vlgmr.msra.gmra.mrb[20].mxu0 %vm179_vm2, %v1847_v58 }
 0xb71   :  { %v1310_v60 = vpop.f32.mrb[20].mxu0 }
 0xb72   :  { %v1314_v61 = vadd.f32 %v1310_v60, %v857_v59  ;;  %v1708_v62 = vpop.f32.mrb[21].mxu0 }
 0xb74   :  { %1848 = vtanh.f32 %v1314_v61 }
 0xb7e   :  { %v1849_v12 = vpop.eup %1848 }
 0xb7f   :  { %1718 = vmatmul.mubr.msk.f32.vlgmr.msra.gmra.mrb[20].mxu1 %vm179_vm2, %v1849_v12 }
 0xc52   :  { %v1385_v63 = vpop.f32.mrb[20].mxu1 }
 0xc53   :  { %v1389_v0 = vadd.f32 %v1385_v63, %v862_v8  ;;  %v1719_v1 = vpop.f32.mrb[21].mxu1 }
 0xc55   :  { %1850 = vtanh.f32 %v1389_v0 }
 0xc5f   :  { %v1851_v2 = vpop.eup %1850 }
 0xc60   :  { %1391 = vst.msk [vmem:[#allocation3] sm:$0xff] %vm179_vm2, %v1851_v2 }
 0xc61   :  { %1863 = shalt.err (!%p1860_p4)
}
 0xc62   :  { %s1864_s21 = scalar_lea.hbm %s2171_s7, 128 }
 0xc63   :  { %p1865_p5 = scmp.ne.s32.totalorder %s2171_s7, %s1864_s21  ;;  %p1868_p6 = scmp.lt.u32.totalorder %s1864_s21, %s2171_s7 }
 0xc65   :  { %p1870_p7 = pnand %p1868_p6, %p1865_p5 }
 0xc67   :  { %1873 = shalt.err (!%p1870_p7)
}
 0xc68   :  { %1401 = dma.vmem_to_hbm [thread:$0]  %s1399_s6, 128, %s2171_s7, [#allocation4]  }
 0xc69   :  { %1874 = dma.done.wait [#allocation4], 128  }
 0xc6a   :  { %1875 = vsyncadd [#allocation4], 4294967168 }
 0xc6b   :  { %1405 = vsyncpa [#allocation4], 1 }

</bundles_post_ra>
